<compile_context>
chip_gen: v7x
topology: tpu7x:2x2x1
jax: 0.10.0
libtpu: 0.0.40
codegen_flags: <defaults>
</compile_context>

<pallas_src>
import jax
import jax.numpy as jnp
from jax.experimental import pallas as pl
from jax.experimental.pallas import tpu as pltpu

HIDDEN = 768


def span_kernel(h1_ref, w_ref, b_ref, out_ref):
    """Single-step: fold batch into the matmul M-dim, then consecutive-row avg."""
    B, rows, H = h1_ref.shape
    num_spans = out_ref.shape[1]                 # static: len(segs) - 1
    C = w_ref.shape[1]

    # (B, rows, 768) -> (B*rows, 768): free relayout (rows is a multiple of 8).
    h = h1_ref[...].reshape(B * rows, H)
    # One MXU pass for the whole batch; f32 accumulate.
    hw = jnp.dot(h, w_ref[...], preferred_element_type=jnp.float32)   # (B*rows, C)
    hw = hw.reshape(B, rows, C)
    # Consecutive-row average on the small post-matmul tensor (VPU, f32).
    avg = (hw[:, :num_spans, :] + hw[:, 1:num_spans + 1, :]) * 0.5    # (B, K, C)
    out_ref[...] = avg + b_ref[...]              # bias (1, C) broadcasts


def make_span_forward(w_cls, b_cls, num_spans):
    """Precompute the transposed classifier once.

    Returns forward(h1_batch): (B, S, 768) f32 -> (B, num_spans, num_classes).
    """
    C, H = w_cls.shape
    assert H == HIDDEN
    w_t = w_cls.T.astype(jnp.float32)                    # (768, C), unpadded
    b_p = b_cls.astype(jnp.float32).reshape(1, C)        # (1, C)

    def forward(h1_batch):
        B, S, Hh = h1_batch.shape
        assert Hh == HIDDEN
        assert num_spans + 1 <= S, (
            f"need num_spans+1={num_spans + 1} rows but seq_len={S}")
        # Only DMA the rows the span average touches (rounded to sublane=8).
        rows = min(S, ((num_spans + 1 + 7) // 8) * 8)

        y = pl.pallas_call(
            span_kernel,
            out_shape=jax.ShapeDtypeStruct((B, num_spans, C), jnp.float32),
            grid=(1,),
            in_specs=[
                pl.BlockSpec((B, rows, Hh), lambda i: (0, 0, 0)),
                pl.BlockSpec((Hh, C), lambda i: (0, 0)),      # full array
                pl.BlockSpec((1, C), lambda i: (0, 0)),       # full array
            ],
            out_specs=pl.BlockSpec((B, num_spans, C), lambda i: (0, 0, 0)),
            compiler_params=pltpu.CompilerParams(
                dimension_semantics=("arbitrary",)),
        )(h1_batch, w_t, b_p)
        return y

    return jax.jit(forward)


if __name__ == "__main__":
    key = jax.random.PRNGKey(0)
    k_emb, k_x, k_w, k_b = jax.random.split(key, 4)

    batch = 4
    seq_len = 16
    vocab = 64
    num_classes = 8
    # segs: only its length matters in the reference forward (len(segs) - 1 spans)
    segs = jnp.arange(9, dtype=jnp.int32)
    num_spans = int(segs.shape[0]) - 1           # = 8

    # "transformer": deterministic embedding lookup standing in for BERT.
    embed_table = jax.random.normal(k_emb, (vocab, HIDDEN), dtype=jnp.float32) * 0.02
    x = jax.random.randint(k_x, (batch, seq_len), 0, vocab)
    h1 = embed_table[x]                          # (batch, seq_len, 768) f32

    # classifier: nn.Linear(768, num_classes), deterministic init.
    w_cls = jax.random.normal(k_w, (num_classes, HIDDEN), dtype=jnp.float32) * 0.02
    b_cls = jax.random.normal(k_b, (num_classes,), dtype=jnp.float32) * 0.01

    span_forward = make_span_forward(w_cls, b_cls, num_spans)
    y = span_forward(h1)
    y = jax.block_until_ready(y)

    # Pure-JAX reference following the PyTorch order (average, then classifier).
    avg_ref = (h1[:, :num_spans] + h1[:, 1:num_spans + 1]) * 0.5     # (B, K, 768)
    y_ref = jnp.einsum("bkh,ch->bkc", avg_ref, w_cls) + b_cls        # (B, K, C)
    assert y.shape == (batch, num_spans, num_classes)
    assert jnp.allclose(y, y_ref, atol=1e-4, rtol=1e-4)

    print("KERNEL_OK")
</pallas_src>

<mosaic_0001>
module attributes {stable_mosaic.version = 11 : i64} {
  func.func @span_kernel(%arg0: i32, %arg1: memref<4x16x768xf32, #tpu.memory_space<vmem>>, %arg2: memref<768x8xf32, #tpu.memory_space<vmem>>, %arg3: memref<1x8xf32, #tpu.memory_space<vmem>>, %arg4: memref<4x8x8xf32, #tpu.memory_space<vmem>>) attributes {dimension_semantics = [#tpu.dimension_semantics<arbitrary>], iteration_bounds = array<i64: 1>, scalar_prefetch = 0 : i64, scratch_operands = 0 : i64, tpu.core_type = #tpu.core_type<tc>, window_params = [{pipeline_mode = #tpu.pipeline_mode<synchronous>, transform_indices = @transform_0, window_bounds = array<i64: 4, 16, 768>}, {pipeline_mode = #tpu.pipeline_mode<synchronous>, transform_indices = @transform_1, window_bounds = array<i64: 768, 8>}, {pipeline_mode = #tpu.pipeline_mode<synchronous>, transform_indices = @transform_2, window_bounds = array<i64: 1, 8>}, {pipeline_mode = #tpu.pipeline_mode<synchronous>, transform_indices = @transform_3, window_bounds = array<i64: 4, 8, 8>}]} {
    %c0 = arith.constant 0 : index
    %c0_0 = arith.constant 0 : index
    %c0_1 = arith.constant 0 : index
    %0 = vector.load %arg1[%c0, %c0_0, %c0_1] : memref<4x16x768xf32, #tpu.memory_space<vmem>>, vector<4x16x768xf32>
    %1 = vector.shape_cast %0 : vector<4x16x768xf32> to vector<64x768xf32>
    %c0_2 = arith.constant 0 : index
    %c0_3 = arith.constant 0 : index
    %2 = vector.load %arg2[%c0_2, %c0_3] : memref<768x8xf32, #tpu.memory_space<vmem>>, vector<768x8xf32>
    %cst = arith.constant dense<0.000000e+00> : vector<64x8xf32>
    %3 = tpu.matmul %1, %2, %cst {dimension_numbers = #tpu.dot_dimension_numbers<[1], [0], [0], [1], [0, 0, 1, 1], [], []>} : vector<64x768xf32>, vector<768x8xf32>, vector<64x8xf32> -> vector<64x8xf32>
    %4 = vector.shape_cast %3 : vector<64x8xf32> to vector<4x16x8xf32>
    %5 = vector.extract_strided_slice %4 {offsets = [0, 0, 0], sizes = [4, 8, 8], strides = [1, 1, 1]} : vector<4x16x8xf32> to vector<4x8x8xf32>
    %6 = vector.extract_strided_slice %4 {offsets = [0, 1, 0], sizes = [4, 8, 8], strides = [1, 1, 1]} : vector<4x16x8xf32> to vector<4x8x8xf32>
    %7 = arith.addf %5, %6 : vector<4x8x8xf32>
    %cst_4 = arith.constant 5.000000e-01 : f32
    %8 = vector.broadcast %cst_4 : f32 to vector<4x8x8xf32>
    %9 = arith.mulf %7, %8 : vector<4x8x8xf32>
    %c0_5 = arith.constant 0 : index
    %c0_6 = arith.constant 0 : index
    %10 = vector.load %arg3[%c0_5, %c0_6] : memref<1x8xf32, #tpu.memory_space<vmem>>, vector<1x8xf32>
    %11 = vector.shape_cast %10 : vector<1x8xf32> to vector<1x1x8xf32>
    %12 = vector.broadcast %11 : vector<1x1x8xf32> to vector<4x8x8xf32>
    %13 = arith.addf %9, %12 : vector<4x8x8xf32>
    %c0_7 = arith.constant 0 : index
    %c0_8 = arith.constant 0 : index
    %c0_9 = arith.constant 0 : index
    %14 = vector.load %arg4[%c0_7, %c0_8, %c0_9] : memref<4x8x8xf32, #tpu.memory_space<vmem>>, vector<4x8x8xf32>
    tpu.vector_store %arg4[%c0_7, %c0_8, %c0_9], %13 {strides = array<i32>} : memref<4x8x8xf32, #tpu.memory_space<vmem>>, vector<4x8x8xf32>,
    return
  }
  func.func @transform_0(%arg0: i32) -> (i32, i32, i32) {
    %c0_i32 = arith.constant 0 : i32
    %c0_i32_0 = arith.constant 0 : i32
    %c0_i32_1 = arith.constant 0 : i32
    %c0_i32_2 = arith.constant 0 : i32
    return %c0_i32, %c0_i32_0, %c0_i32_1 : i32, i32, i32
  }
  func.func @transform_1(%arg0: i32) -> (i32, i32) {
    %c0_i32 = arith.constant 0 : i32
    %c0_i32_0 = arith.constant 0 : i32
    %c0_i32_1 = arith.constant 0 : i32
    return %c0_i32, %c0_i32_0 : i32, i32
  }
  func.func @transform_2(%arg0: i32) -> (i32, i32) {
    %c0_i32 = arith.constant 0 : i32
    %c0_i32_0 = arith.constant 0 : i32
    %c0_i32_1 = arith.constant 0 : i32
    return %c0_i32, %c0_i32_0 : i32, i32
  }
  func.func @transform_3(%arg0: i32) -> (i32, i32, i32) {
    %c0_i32 = arith.constant 0 : i32
    %c0_i32_0 = arith.constant 0 : i32
    %c0_i32_1 = arith.constant 0 : i32
    %c0_i32_2 = arith.constant 0 : i32
    return %c0_i32, %c0_i32_0, %c0_i32_1 : i32, i32, i32
  }
}

</mosaic_0001>

<bundles_post_ra>
// kernel: forward.1
= control target key start
LH: loop header
LB: loop body
LE: loop exit
PB: predicated region body
PF: predicated region fallthrough
CT: control target
= control target key end

     0   :  { %8 = vsyncpa [#allocation3], 0  ;;  %s1015_s0 = inlined_call_operand.hbm [shape: f32[4,16,768], index: 0, kind: input, shape index: {}]   ;;  %s1016_s1 = inlined_call_operand.hbm [shape: f32[768,8], index: 1, kind: input, shape index: {}]   ;;  %s1017_s2 = inlined_call_operand.vmem [shape: f32[1,8], index: 2, kind: input, shape index: {}]   ;;  %s1018_s3 = inlined_call_operand.hbm [shape: f32[4,8,8], index: 3, kind: output, shape index: {}]  }
   0x1   :  { %9 = vsyncpa [#allocation6], 0 }
   0x2   :  { %10 = vsyncpa [#allocation4], 0  ;;  %s929_s12 = smov [#allocation2]   ;;  %s857_s16 = scalar_lea.hbm %s1015_s0, 6144 }
   0x3   :  { %s16_s13 = sshll.u32 %s929_s12, 4  ;;  %p858_p0 = scmp.ne.s32.totalorder %s1015_s0, %s857_s16  ;;  %s17_s13 = int_to_ptr.vmem [resolvable:$true] %s16_s13 }
   0x4   :  { %p861_p1 = scmp.lt.u32.totalorder %s857_s16, %s1015_s0 }
   0x6   :  { %p863_p2 = pnand %p861_p1, %p858_p0 }
   0x8   :  { %866 = shalt.err (!%p863_p2)
}
   0x9   :  { %s867_s21 = scalar_lea.vmem %s17_s13, 6144  ;;  %p872_p4 = scmp.lt.s32.totalorder %s17_s13, %s17_s13 }
   0xa   :  { %p868_p3 = scmp.ne.s32.totalorder %s17_s13, %s867_s21  ;;  %p873_p5 = scmp.lt.s32.totalorder %s867_s21, %s867_s21 }
   0xc   :  { %p874_p6 = por %p873_p5, %p872_p4 }
   0xe   :  { %p875_p7 = pnand %p874_p6, %p868_p3 }
  0x10   :  { %878 = shalt.err (!%p875_p7)
}
  0x11   :  { %s930_s22 = smov 768   ;;  %s931_s23 = smov 48  }
  0x12   :  { %22 = dma.hbm_to_vmem [thread:$0]  %s1015_s0, 6144, %s17_s13, [#allocation3], %s930_s22, %s930_s22, %s931_s23  }
  0x13   :  { %s932_s26 = smov [#allocation5]   ;;  %s879_s30 = scalar_lea.hbm %s1016_s1, 12288 }
  0x14   :  { %s28_s27 = sshll.u32 %s932_s26, 4  ;;  %p880_p8 = scmp.ne.s32.totalorder %s1016_s1, %s879_s30  ;;  %s29_s27 = int_to_ptr.vmem [resolvable:$true] %s28_s27 }
  0x15   :  { %p883_p9 = scmp.lt.u32.totalorder %s879_s30, %s1016_s1 }
  0x17   :  { %p885_p10 = pnand %p883_p9, %p880_p8 }
  0x19   :  { %888 = shalt.err (!%p885_p10)
}
  0x1a   :  { %s889_s8 = scalar_lea.vmem %s29_s27, 12288  ;;  %p894_p12 = scmp.lt.s32.totalorder %s29_s27, %s29_s27 }
  0x1b   :  { %p890_p11 = scmp.ne.s32.totalorder %s29_s27, %s889_s8  ;;  %p895_p13 = scmp.lt.s32.totalorder %s889_s8, %s889_s8 }
  0x1d   :  { %p896_p0 = por %p895_p13, %p894_p12 }
  0x1f   :  { %p897_p1 = pnand %p896_p0, %p890_p11 }
  0x21   :  { %900 = shalt.err (!%p897_p1)
}
  0x22   :  { %s933_s0 = smov 128   ;;  %s934_s9 = smov 8  }
  0x23   :  { %34 = dma.hbm_to_vmem [thread:$0]  %s1016_s1, 12288, %s29_s27, [#allocation6], %s933_s0, %s933_s0, %s934_s9  }
  0x24   :  { %923 = dma.done.wait [#allocation3], 6144  }
  0x25   :  { %924 = vsyncadd [#allocation3], 4294961152 }
  0x26   :  { %925 = dma.done.wait [#allocation6], 12288  }
  0x27   :  { %926 = vsyncadd [#allocation6], 4294955008  ;;  %v107_v0 = vld [vmem:[#allocation5 + $0x80] sm:$0xff]  ;;  %v108_v1 = vld [vmem:[#allocation5 + $0x88] sm:$0xff]  ;;  %vm510_vm0 = vcmask 1046528   ;;  %vm546_vm1 = vcmask 64512  }
  0x28   :  { %v139_v2 = vld [vmem:[#allocation5 + $0x180] sm:$0xff]  ;;  %v738_v3 = vpack.c.bf16 %v108_v1, %v107_v0  ;;  %v140_v4 = vld [vmem:[#allocation5 + $0x188] sm:$0xff]  ;;  %v109_v11 = vld [vmem:[#allocation5 + $0x90] sm:$0xff] }
  0x29   :  { %v91_v5 = vld [vmem:[#allocation5] sm:$0xff]  ;;  %v92_v6 = vld [vmem:[#allocation5 + $0x8] sm:$0xff]  ;;  %v770_v7 = vpack.c.bf16 %v140_v4, %v139_v2  ;;  %v110_v13 = vld [vmem:[#allocation5 + $0x98] sm:$0xff] }
  0x2a   :  { %v740_v8 = vpack.c.bf16 %v92_v6, %v91_v5  ;;  %v123_v9 = vld [vmem:[#allocation5 + $0x100] sm:$0xff]  ;;  %v124_v10 = vld [vmem:[#allocation5 + $0x108] sm:$0xff]  ;;  %739 = vmatprep.subr.bf16.mxu0 %v738_v3  ;;  %v141_v14 = vld [vmem:[#allocation5 + $0x190] sm:$0xff]  ;;  %v742_v16 = vpack.c.bf16 %v110_v13, %v109_v11 }
  0x2b   :  { %v772_v12 = vpack.c.bf16 %v124_v10, %v123_v9  ;;  %v142_v15 = vld [vmem:[#allocation5 + $0x198] sm:$0xff]  ;;  %771 = vmatprep.subr.bf16.mxu1 %v770_v7  ;;  %v93_v18 = vld [vmem:[#allocation5 + $0x10] sm:$0xff]  ;;  %v111_v23 = vld [vmem:[#allocation5 + $0xa0] sm:$0xff] }
  0x2c   :  { %741 = vmatpush3.bf16.msra.mxu0 %v740_v8  ;;  %v774_v17 = vpack.c.bf16 %v142_v15, %v141_v14  ;;  %v94_v19 = vld [vmem:[#allocation5 + $0x18] sm:$0xff]  ;;  %v125_v20 = vld [vmem:[#allocation5 + $0x110] sm:$0xff]  ;;  %v112_v24 = vld [vmem:[#allocation5 + $0xa8] sm:$0xff] }
  0x2d   :  { %773 = vmatpush3.bf16.msra.mxu1 %v772_v12  ;;  %v744_v21 = vpack.c.bf16 %v94_v19, %v93_v18  ;;  %v126_v22 = vld [vmem:[#allocation5 + $0x118] sm:$0xff]  ;;  %743 = vmatprep.subr.bf16.mxu0 %v742_v16  ;;  %v746_v26 = vpack.c.bf16 %v112_v24, %v111_v23  ;;  %v143_v27 = vld [vmem:[#allocation5 + $0x1a0] sm:$0xff]  ;;  %v144_v28 = vld [vmem:[#allocation5 + $0x1a8] sm:$0xff] }
  0x2e   :  { %775 = vmatprep.subr.bf16.mxu1 %v774_v17  ;;  %v776_v25 = vpack.c.bf16 %v126_v22, %v125_v20  ;;  %v95_v29 = vld [vmem:[#allocation5 + $0x20] sm:$0xff]  ;;  %v778_v30 = vpack.c.bf16 %v144_v28, %v143_v27  ;;  %v96_v31 = vld [vmem:[#allocation5 + $0x28] sm:$0xff]  ;;  %v113_v35 = vld [vmem:[#allocation5 + $0xb0] sm:$0xff] }
  0x2f   :  { %v127_v32 = vld [vmem:[#allocation5 + $0x120] sm:$0xff]  ;;  %v128_v33 = vld [vmem:[#allocation5 + $0x128] sm:$0xff]  ;;  %v748_v34 = vpack.c.bf16 %v96_v31, %v95_v29  ;;  %v114_v36 = vld [vmem:[#allocation5 + $0xb8] sm:$0xff] }
  0x30   :  { %745 = vmatpush3.bf16.msra.mxu0 %v744_v21  ;;  %v145_v37 = vld [vmem:[#allocation5 + $0x1b0] sm:$0xff]  ;;  %v780_v38 = vpack.c.bf16 %v128_v33, %v127_v32  ;;  %v750_v39 = vpack.c.bf16 %v114_v36, %v113_v35  ;;  %v146_v40 = vld [vmem:[#allocation5 + $0x1b8] sm:$0xff]  ;;  %v115_v46 = vld [vmem:[#allocation5 + $0xc0] sm:$0xff] }
  0x31   :  { %777 = vmatpush3.bf16.msra.mxu1 %v776_v25  ;;  %747 = vmatprep.subr.bf16.mxu0 %v746_v26  ;;  %v97_v41 = vld [vmem:[#allocation5 + $0x30] sm:$0xff]  ;;  %v98_v42 = vld [vmem:[#allocation5 + $0x38] sm:$0xff]  ;;  %v782_v43 = vpack.c.bf16 %v146_v40, %v145_v37  ;;  %v116_v47 = vld [vmem:[#allocation5 + $0xc8] sm:$0xff] }
  0x32   :  { %779 = vmatprep.subr.bf16.mxu1 %v778_v30  ;;  %v129_v44 = vld [vmem:[#allocation5 + $0x130] sm:$0xff]  ;;  %v130_v45 = vld [vmem:[#allocation5 + $0x138] sm:$0xff]  ;;  %v147_v48 = vld [vmem:[#allocation5 + $0x1c0] sm:$0xff]  ;;  %v752_v50 = vpack.c.bf16 %v98_v42, %v97_v41  ;;  %v754_v52 = vpack.c.bf16 %v116_v47, %v115_v46 }
  0x33   :  { %v148_v49 = vld [vmem:[#allocation5 + $0x1c8] sm:$0xff]  ;;  %v784_v51 = vpack.c.bf16 %v130_v45, %v129_v44  ;;  %v99_v53 = vld [vmem:[#allocation5 + $0x40] sm:$0xff]  ;;  %v117_v58 = vld [vmem:[#allocation5 + $0xd0] sm:$0xff] }
  0x34   :  { %749 = vmatpush3.bf16.msra.mxu0 %v748_v34  ;;  %v100_v54 = vld [vmem:[#allocation5 + $0x48] sm:$0xff]  ;;  %v131_v55 = vld [vmem:[#allocation5 + $0x140] sm:$0xff]  ;;  %v786_v56 = vpack.c.bf16 %v148_v49, %v147_v48  ;;  %v118_v59 = vld [vmem:[#allocation5 + $0xd8] sm:$0xff] }
  0x35   :  { %781 = vmatpush3.bf16.msra.mxu1 %v780_v38  ;;  %751 = vmatprep.subr.bf16.mxu0 %v750_v39  ;;  %v132_v57 = vld [vmem:[#allocation5 + $0x148] sm:$0xff]  ;;  %v149_v60 = vld [vmem:[#allocation5 + $0x1d0] sm:$0xff]  ;;  %v150_v61 = vld [vmem:[#allocation5 + $0x1d8] sm:$0xff]  ;;  %v756_v62 = vpack.c.bf16 %v100_v54, %v99_v53  ;;  %v758_v0 = vpack.c.bf16 %v118_v59, %v117_v58 }
  0x36   :  { %783 = vmatprep.subr.bf16.mxu1 %v782_v43  ;;  %v788_v63 = vpack.c.bf16 %v132_v57, %v131_v55  ;;  %v101_v1 = vld [vmem:[#allocation5 + $0x50] sm:$0xff]  ;;  %v102_v2 = vld [vmem:[#allocation5 + $0x58] sm:$0xff]  ;;  %v790_v4 = vpack.c.bf16 %v150_v61, %v149_v60  ;;  %v119_v6 = vld [vmem:[#allocation5 + $0xe0] sm:$0xff] }
  0x37   :  { %v133_v3 = vld [vmem:[#allocation5 + $0x150] sm:$0xff]  ;;  %v134_v5 = vld [vmem:[#allocation5 + $0x158] sm:$0xff]  ;;  %v120_v7 = vld [vmem:[#allocation5 + $0xe8] sm:$0xff]  ;;  %v760_v10 = vpack.c.bf16 %v102_v2, %v101_v1 }
  0x38   :  { %753 = vmatpush3.bf16.msra.mxu0 %v752_v50  ;;  %v151_v8 = vld [vmem:[#allocation5 + $0x1e0] sm:$0xff]  ;;  %v152_v9 = vld [vmem:[#allocation5 + $0x1e8] sm:$0xff]  ;;  %v792_v13 = vpack.c.bf16 %v134_v5, %v133_v3  ;;  %v762_v14 = vpack.c.bf16 %v120_v7, %v119_v6  ;;  %v46_v17 = vld [vmem:[#allocation2 + $0x18] sm:$0xff] }
  0x39   :  { %785 = vmatpush3.bf16.msra.mxu1 %v784_v51  ;;  %755 = vmatprep.subr.bf16.mxu0 %v754_v52  ;;  %v103_v11 = vld [vmem:[#allocation5 + $0x60] sm:$0xff]  ;;  %v104_v12 = vld [vmem:[#allocation5 + $0x68] sm:$0xff]  ;;  %v794_v18 = vpack.c.bf16 %v152_v9, %v151_v8  ;;  %v121_v20 = vld [vmem:[#allocation5 + $0xf0] sm:$0xff] }
  0x3a   :  { %787 = vmatprep.subr.bf16.mxu1 %v786_v56  ;;  %v135_v15 = vld [vmem:[#allocation5 + $0x160] sm:$0xff]  ;;  %v44_v16 = vld [vmem:[#allocation2 + $0x8] sm:$0xff]  ;;  %v122_v21 = vld [vmem:[#allocation5 + $0xf8] sm:$0xff]  ;;  %356 = vmatprep.mubr.f32.mxu1 %v46_v17  ;;  %v764_v24 = vpack.c.bf16 %v104_v12, %v103_v11 }
  0x3b   :  { %v136_v19 = vld [vmem:[#allocation5 + $0x168] sm:$0xff]  ;;  %251 = vmatprep.mubr.f32.mxu0 %v44_v16  ;;  %v153_v22 = vld [vmem:[#allocation5 + $0x1f0] sm:$0xff]  ;;  %v154_v23 = vld [vmem:[#allocation5 + $0x1f8] sm:$0xff]  ;;  %v766_v26 = vpack.c.bf16 %v122_v21, %v121_v20 }
  0x3c   :  { %757 = vmatpush3.bf16.msra.mxu0 %v756_v62  ;;  %v796_v25 = vpack.c.bf16 %v136_v19, %v135_v15  ;;  %v105_v27 = vld [vmem:[#allocation5 + $0x70] sm:$0xff]  ;;  %v106_v28 = vld [vmem:[#allocation5 + $0x78] sm:$0xff]  ;;  %v798_v30 = vpack.c.bf16 %v154_v23, %v153_v22  ;;  %v171_v32 = vld [vmem:[#allocation5 + $0x280] sm:$0xff] }
  0x3d   :  { %789 = vmatpush3.bf16.msra.mxu1 %v788_v63  ;;  %759 = vmatprep.subr.bf16.mxu0 %v758_v0  ;;  %v137_v29 = vld [vmem:[#allocation5 + $0x170] sm:$0xff]  ;;  %v138_v31 = vld [vmem:[#allocation5 + $0x178] sm:$0xff]  ;;  %v172_v33 = vld [vmem:[#allocation5 + $0x288] sm:$0xff]  ;;  %v768_v34 = vpack.c.bf16 %v106_v28, %v105_v27 }
  0x3e   :  { %791 = vmatprep.subr.bf16.mxu1 %v790_v4  ;;  %v800_v35 = vpack.c.bf16 %v138_v31, %v137_v29  ;;  %v802_v36 = vpack.c.bf16 %v172_v33, %v171_v32  ;;  %v155_v37 = vld [vmem:[#allocation5 + $0x200] sm:$0xff]  ;;  %v156_v38 = vld [vmem:[#allocation5 + $0x208] sm:$0xff]  ;;  %v173_v39 = vld [vmem:[#allocation5 + $0x290] sm:$0xff] }
  0x3f   :  { %v174_v40 = vld [vmem:[#allocation5 + $0x298] sm:$0xff]  ;;  %v43_v41 = vld [vmem:[#allocation2] sm:$0xff]  ;;  %v804_v42 = vpack.c.bf16 %v156_v38, %v155_v37  ;;  %v45_v43 = vld [vmem:[#allocation2 + $0x10] sm:$0xff] }
  0x40   :  { %761 = vmatpush3.bf16.msra.mxu0 %v760_v10  ;;  %v157_v44 = vld [vmem:[#allocation5 + $0x210] sm:$0xff]  ;;  %v158_v45 = vld [vmem:[#allocation5 + $0x218] sm:$0xff]  ;;  %v806_v47 = vpack.c.bf16 %v174_v40, %v173_v39  ;;  %v52_v48 = vld [vmem:[#allocation2 + $0x48] sm:$0xff] }
  0x41   :  { %793 = vmatpush3.bf16.msra.mxu1 %v792_v13  ;;  %763 = vmatprep.subr.bf16.mxu0 %v762_v14  ;;  %v50_v46 = vld [vmem:[#allocation2 + $0x38] sm:$0xff]  ;;  %v175_v49 = vld [vmem:[#allocation5 + $0x2a0] sm:$0xff]  ;;  %v176_v50 = vld [vmem:[#allocation5 + $0x2a8] sm:$0xff]  ;;  %v808_v52 = vpack.c.bf16 %v158_v45, %v157_v44 }
  0x42   :  { %795 = vmatprep.subr.bf16.mxu1 %v794_v18  ;;  %v49_v51 = vld [vmem:[#allocation2 + $0x30] sm:$0xff]  ;;  %v51_v53 = vld [vmem:[#allocation2 + $0x40] sm:$0xff]  ;;  %v160_v55 = vld [vmem:[#allocation5 + $0x228] sm:$0xff]  ;;  %v810_v57 = vpack.c.bf16 %v176_v50, %v175_v49 }
  0x43   :  { %v159_v54 = vld [vmem:[#allocation5 + $0x220] sm:$0xff]  ;;  %v56_v56 = vld [vmem:[#allocation2 + $0x68] sm:$0xff]  ;;  %v58_v58 = vld [vmem:[#allocation2 + $0x78] sm:$0xff] }
  0x44   :  { %765 = vmatpush3.bf16.msra.mxu0 %v764_v24  ;;  %v177_v59 = vld [vmem:[#allocation5 + $0x2b0] sm:$0xff]  ;;  %v178_v60 = vld [vmem:[#allocation5 + $0x2b8] sm:$0xff]  ;;  %v55_v61 = vld [vmem:[#allocation2 + $0x60] sm:$0xff]  ;;  %v812_v62 = vpack.c.bf16 %v160_v55, %v159_v54 }
  0x45   :  { %797 = vmatpush3.bf16.msra.mxu1 %v796_v25  ;;  %767 = vmatprep.subr.bf16.mxu0 %v766_v26  ;;  %v57_v63 = vld [vmem:[#allocation2 + $0x70] sm:$0xff]  ;;  %v162_v1 = vld [vmem:[#allocation5 + $0x238] sm:$0xff]  ;;  %v814_v3 = vpack.c.bf16 %v178_v60, %v177_v59  ;;  %v64_v4 = vld [vmem:[#allocation2 + $0xa8] sm:$0xff] }
  0x46   :  { %799 = vmatprep.subr.bf16.mxu1 %v798_v30  ;;  %v161_v0 = vld [vmem:[#allocation5 + $0x230] sm:$0xff]  ;;  %v62_v2 = vld [vmem:[#allocation2 + $0x98] sm:$0xff]  ;;  %v179_v5 = vld [vmem:[#allocation5 + $0x2c0] sm:$0xff] }
  0x47   :  { %v180_v6 = vld [vmem:[#allocation5 + $0x2c8] sm:$0xff]  ;;  %v61_v7 = vld [vmem:[#allocation2 + $0x90] sm:$0xff]  ;;  %v816_v8 = vpack.c.bf16 %v162_v1, %v161_v0  ;;  %v63_v9 = vld [vmem:[#allocation2 + $0xa0] sm:$0xff] }
  0x48   :  { %769 = vmatpush3.bf16.msra.mxu0 %v768_v34  ;;  %v163_v10 = vld [vmem:[#allocation5 + $0x240] sm:$0xff]  ;;  %v164_v11 = vld [vmem:[#allocation5 + $0x248] sm:$0xff]  ;;  %v818_v13 = vpack.c.bf16 %v180_v6, %v179_v5  ;;  %v70_v14 = vld [vmem:[#allocation2 + $0xd8] sm:$0xff] }
  0x49   :  { %801 = vmatpush3.bf16.msra.mxu1 %v800_v35  ;;  %803 = vmatprep.subr.bf16.mxu0 %v802_v36  ;;  %v68_v12 = vld [vmem:[#allocation2 + $0xc8] sm:$0xff]  ;;  %v181_v15 = vld [vmem:[#allocation5 + $0x2d0] sm:$0xff]  ;;  %v182_v16 = vld [vmem:[#allocation5 + $0x2d8] sm:$0xff]  ;;  %v820_v18 = vpack.c.bf16 %v164_v11, %v163_v10 }
  0x4a   :  { %834 = vmatprep.subr.bf16.mxu1 %v802_v36  ;;  %v67_v17 = vld [vmem:[#allocation2 + $0xc0] sm:$0xff]  ;;  %v69_v19 = vld [vmem:[#allocation2 + $0xd0] sm:$0xff]  ;;  %v166_v21 = vld [vmem:[#allocation5 + $0x258] sm:$0xff]  ;;  %v822_v23 = vpack.c.bf16 %v182_v16, %v181_v15 }
  0x4b   :  { %252 = vmatmul.mubr.f32.vlgmr.msra.gmra.mrb[0].mxu0 %v43_v41  ;;  %v165_v20 = vld [vmem:[#allocation5 + $0x250] sm:$0xff]  ;;  %v74_v22 = vld [vmem:[#allocation2 + $0xf8] sm:$0xff]  ;;  %v76_v24 = vld [vmem:[#allocation2 + $0x108] sm:$0xff] }
  0x4c   :  { %357 = vmatmul.mubr.f32.vlgmr.msra.gmra.mrb[0].mxu1 %v45_v43  ;;  %805 = vmatpush3.bf16.msra.mxu0 %v804_v42  ;;  %v183_v25 = vld [vmem:[#allocation5 + $0x2e0] sm:$0xff]  ;;  %v184_v26 = vld [vmem:[#allocation5 + $0x2e8] sm:$0xff]  ;;  %v73_v27 = vld [vmem:[#allocation2 + $0xf0] sm:$0xff]  ;;  %v824_v28 = vpack.c.bf16 %v166_v21, %v165_v20 }
  0x4d   :  { %842 = vmatpush3.bf16.msra.mxu1 %v804_v42  ;;  %256 = vmatprep.mubr.f32.mxu0 %v50_v46  ;;  %v75_v29 = vld [vmem:[#allocation2 + $0x100] sm:$0xff]  ;;  %v168_v31 = vld [vmem:[#allocation5 + $0x268] sm:$0xff]  ;;  %v826_v33 = vpack.c.bf16 %v184_v26, %v183_v25  ;;  %v82_v34 = vld [vmem:[#allocation2 + $0x138] sm:$0xff] }
  0x4e   :  { %361 = vmatprep.mubr.f32.mxu1 %v52_v48  ;;  %807 = vmatprep.subr.bf16.mxu0 %v806_v47  ;;  %v167_v30 = vld [vmem:[#allocation5 + $0x260] sm:$0xff]  ;;  %v80_v32 = vld [vmem:[#allocation2 + $0x128] sm:$0xff]  ;;  %v185_v35 = vld [vmem:[#allocation5 + $0x2f0] sm:$0xff] }
  0x4f   :  { %257 = vmatmul.mubr.f32.gmra.mrb[2].mxu0 %v49_v51  ;;  %835 = vmatprep.subr.bf16.mxu1 %v806_v47  ;;  %v186_v36 = vld [vmem:[#allocation5 + $0x2f8] sm:$0xff]  ;;  %v79_v37 = vld [vmem:[#allocation2 + $0x120] sm:$0xff]  ;;  %v828_v38 = vpack.c.bf16 %v168_v31, %v167_v30  ;;  %v81_v39 = vld [vmem:[#allocation2 + $0x130] sm:$0xff] }
  0x50   :  { %362 = vmatmul.mubr.f32.gmra.mrb[2].mxu1 %v51_v53  ;;  %809 = vmatpush3.bf16.msra.mxu0 %v808_v52  ;;  %v169_v40 = vld [vmem:[#allocation5 + $0x270] sm:$0xff]  ;;  %v170_v41 = vld [vmem:[#allocation5 + $0x278] sm:$0xff]  ;;  %v830_v43 = vpack.c.bf16 %v186_v36, %v185_v35  ;;  %v88_v44 = vld [vmem:[#allocation2 + $0x168] sm:$0xff] }
  0x51   :  { %843 = vmatpush3.bf16.msra.mxu1 %v808_v52  ;;  %261 = vmatprep.mubr.f32.mxu0 %v56_v56  ;;  %v86_v42 = vld [vmem:[#allocation2 + $0x158] sm:$0xff]  ;;  %v85_v45 = vld [vmem:[#allocation2 + $0x150] sm:$0xff]  ;;  %v832_v46 = vpack.c.bf16 %v170_v41, %v169_v40  ;;  %v87_v47 = vld [vmem:[#allocation2 + $0x160] sm:$0xff] }
  0x52   :  { %366 = vmatprep.mubr.f32.mxu1 %v58_v58  ;;  %811 = vmatprep.subr.bf16.mxu0 %v810_v57  ;;  %v48_v48 = vld [vmem:[#allocation2 + $0x28] sm:$0xff]  ;;  %v47_v50 = vld [vmem:[#allocation2 + $0x20] sm:$0xff]  ;;  %v54_v52 = vld [vmem:[#allocation2 + $0x58] sm:$0xff] }
  0x53   :  { %262 = vmatmul.mubr.f32.gmra.mrb[4].mxu0 %v55_v61  ;;  %836 = vmatprep.subr.bf16.mxu1 %v810_v57  ;;  %v72_v49 = vld [vmem:[#allocation2 + $0xe8] sm:$0xff]  ;;  %v71_v51 = vld [vmem:[#allocation2 + $0xe0] sm:$0xff]  ;;  %v78_v53 = vld [vmem:[#allocation2 + $0x118] sm:$0xff] }
  0x54   :  { %367 = vmatmul.mubr.f32.gmra.mrb[4].mxu1 %v57_v63  ;;  %813 = vmatpush3.bf16.msra.mxu0 %v812_v62  ;;  %v53_v54 = vld [vmem:[#allocation2 + $0x50] sm:$0xff]  ;;  %v60_v56 = vld [vmem:[#allocation2 + $0x88] sm:$0xff]  ;;  %v59_v58 = vld [vmem:[#allocation2 + $0x80] sm:$0xff] }
  0x55   :  { %844 = vmatpush3.bf16.msra.mxu1 %v812_v62  ;;  %266 = vmatprep.mubr.f32.mxu0 %v62_v2  ;;  %v77_v55 = vld [vmem:[#allocation2 + $0x110] sm:$0xff]  ;;  %v84_v57 = vld [vmem:[#allocation2 + $0x148] sm:$0xff]  ;;  %v83_v59 = vld [vmem:[#allocation2 + $0x140] sm:$0xff] }
  0x56   :  { %371 = vmatprep.mubr.f32.mxu1 %v64_v4  ;;  %815 = vmatprep.subr.bf16.mxu0 %v814_v3  ;;  %v66_v60 = vld [vmem:[#allocation2 + $0xb8] sm:$0xff]  ;;  %v65_v62 = vld [vmem:[#allocation2 + $0xb0] sm:$0xff] }
  0x57   :  { %267 = vmatmul.mubr.f32.gmra.mrb[6].mxu0 %v61_v7  ;;  %837 = vmatprep.subr.bf16.mxu1 %v814_v3  ;;  %v90_v61 = vld [vmem:[#allocation2 + $0x178] sm:$0xff]  ;;  %v89_v63 = vld [vmem:[#allocation2 + $0x170] sm:$0xff] }
  0x58   :  { %372 = vmatmul.mubr.f32.gmra.mrb[6].mxu1 %v63_v9  ;;  %817 = vmatpush3.bf16.msra.mxu0 %v816_v8 }
  0x59   :  { %845 = vmatpush3.bf16.msra.mxu1 %v816_v8  ;;  %271 = vmatprep.mubr.f32.mxu0 %v68_v12 }
  0x5a   :  { %376 = vmatprep.mubr.f32.mxu1 %v70_v14  ;;  %819 = vmatprep.subr.bf16.mxu0 %v818_v13 }
  0x5b   :  { %272 = vmatmul.mubr.f32.gmra.mrb[8].mxu0 %v67_v17  ;;  %838 = vmatprep.subr.bf16.mxu1 %v818_v13 }
  0x5c   :  { %377 = vmatmul.mubr.f32.gmra.mrb[8].mxu1 %v69_v19  ;;  %821 = vmatpush3.bf16.msra.mxu0 %v820_v18 }
  0x5d   :  { %846 = vmatpush3.bf16.msra.mxu1 %v820_v18  ;;  %276 = vmatprep.mubr.f32.mxu0 %v74_v22 }
  0x5e   :  { %381 = vmatprep.mubr.f32.mxu1 %v76_v24  ;;  %823 = vmatprep.subr.bf16.mxu0 %v822_v23 }
  0x5f   :  { %277 = vmatmul.mubr.f32.gmra.mrb[10].mxu0 %v73_v27  ;;  %839 = vmatprep.subr.bf16.mxu1 %v822_v23 }
  0x60   :  { %382 = vmatmul.mubr.f32.gmra.mrb[10].mxu1 %v75_v29  ;;  %825 = vmatpush3.bf16.msra.mxu0 %v824_v28 }
  0x61   :  { %847 = vmatpush3.bf16.msra.mxu1 %v824_v28  ;;  %281 = vmatprep.mubr.f32.mxu0 %v80_v32 }
  0x62   :  { %386 = vmatprep.mubr.f32.mxu1 %v82_v34  ;;  %827 = vmatprep.subr.bf16.mxu0 %v826_v33 }
  0x63   :  { %282 = vmatmul.mubr.f32.gmra.mrb[12].mxu0 %v79_v37  ;;  %840 = vmatprep.subr.bf16.mxu1 %v826_v33 }
  0x64   :  { %387 = vmatmul.mubr.f32.gmra.mrb[12].mxu1 %v81_v39  ;;  %829 = vmatpush3.bf16.msra.mxu0 %v828_v38 }
  0x65   :  { %848 = vmatpush3.bf16.msra.mxu1 %v828_v38  ;;  %286 = vmatprep.mubr.f32.mxu0 %v86_v42 }
  0x66   :  { %391 = vmatprep.mubr.f32.mxu1 %v88_v44  ;;  %831 = vmatprep.subr.bf16.mxu0 %v830_v43 }
  0x67   :  { %287 = vmatmul.mubr.f32.gmra.mrb[14].mxu0 %v85_v45  ;;  %841 = vmatprep.subr.bf16.mxu1 %v830_v43 }
  0x68   :  { %392 = vmatmul.mubr.f32.gmra.mrb[14].mxu1 %v87_v47  ;;  %833 = vmatpush3.bf16.msra.mxu0 %v832_v46 }
  0x69   :  { %849 = vmatpush3.bf16.msra.mxu1 %v832_v46  ;;  %461 = vmatprep.mubr.f32.mxu0 %v48_v48 }
  0x6a   :  { %481 = vmatprep.mubr.f32.mxu1 %v72_v49 }
  0x6b   :  { %462 = vmatmul.mubr.f32.vlgmr.msra.gmra.mrb[16].mxu0 %v47_v50 }
  0x6c   :  { %482 = vmatmul.mubr.f32.vlgmr.msra.gmra.mrb[16].mxu1 %v71_v51  ;;  %466 = vmatprep.mubr.f32.mxu0 %v54_v52 }
  0x6d   :  { %486 = vmatprep.mubr.f32.mxu1 %v78_v53 }
  0x6f   :  { %467 = vmatmul.mubr.f32.gmra.mrb[18].mxu0 %v53_v54 }
  0x70   :  { %487 = vmatmul.mubr.f32.gmra.mrb[18].mxu1 %v77_v55  ;;  %471 = vmatprep.mubr.f32.mxu0 %v60_v56 }
  0x71   :  { %491 = vmatprep.mubr.f32.mxu1 %v84_v57 }
  0x73   :  { %472 = vmatmul.mubr.f32.gmra.mrb[20].mxu0 %v59_v58 }
  0x74   :  { %492 = vmatmul.mubr.f32.gmra.mrb[20].mxu1 %v83_v59  ;;  %476 = vmatprep.mubr.f32.mxu0 %v66_v60 }
  0x75   :  { %496 = vmatprep.mubr.f32.mxu1 %v90_v61 }
  0x77   :  { %477 = vmatmul.mubr.f32.gmra.mrb[22].mxu0 %v65_v62 }
  0x78   :  { %497 = vmatmul.mubr.f32.gmra.mrb[22].mxu1 %v89_v63 }
 0x11e   :  { %v602_v0 = vpop.f32.mrb[0].mxu0 }
 0x11f   :  { %v658_v1 = vpop.f32.mrb[0].mxu1  ;;  %v603_v2 = vpop.f32.mrb[1].mxu0 }
 0x120   :  { %v604_v3 = vadd.f32 %v603_v2, %v602_v0  ;;  %v659_v4 = vpop.f32.mrb[1].mxu1 }
 0x121   :  { %v660_v5 = vadd.f32 %v659_v4, %v658_v1 }
 0x122   :  { %v605_v6 = vpop.f32.mrb[2].mxu0 }
 0x123   :  { %v359_v7 = vadd.f32 %v660_v5, %v604_v3  ;;  %v661_v8 = vpop.f32.mrb[2].mxu1  ;;  %v606_v9 = vpop.f32.mrb[3].mxu0 }
 0x124   :  { %v607_v10 = vadd.f32 %v606_v9, %v605_v6  ;;  %v662_v11 = vpop.f32.mrb[3].mxu1 }
 0x125   :  { %v663_v12 = vadd.f32 %v662_v11, %v661_v8 }
 0x126   :  { %v608_v13 = vpop.f32.mrb[4].mxu0 }
 0x127   :  { %v364_v14 = vadd.f32 %v663_v12, %v607_v10  ;;  %v664_v15 = vpop.f32.mrb[4].mxu1  ;;  %v609_v16 = vpop.f32.mrb[5].mxu0 }
 0x128   :  { %v610_v17 = vadd.f32 %v609_v16, %v608_v13  ;;  %v665_v18 = vpop.f32.mrb[5].mxu1 }
 0x129   :  { %v666_v19 = vadd.f32 %v665_v18, %v664_v15 }
 0x12a   :  { %v611_v20 = vpop.f32.mrb[6].mxu0 }
 0x12b   :  { %v983_v21 = vadd.f32 %v666_v19, %v610_v17  ;;  %v667_v22 = vpop.f32.mrb[6].mxu1  ;;  %v612_v23 = vpop.f32.mrb[7].mxu0 }
 0x12c   :  { %v613_v24 = vadd.f32 %v612_v23, %v611_v20  ;;  %v668_v25 = vpop.f32.mrb[7].mxu1 }
 0x12d   :  { %v669_v26 = vadd.f32 %v668_v25, %v667_v22 }
 0x12e   :  { %v614_v27 = vpop.f32.mrb[8].mxu0 }
 0x12f   :  { %v985_v28 = vadd.f32 %v669_v26, %v613_v24  ;;  %v670_v29 = vpop.f32.mrb[8].mxu1  ;;  %v615_v30 = vpop.f32.mrb[9].mxu0 }
 0x130   :  { %v616_v31 = vadd.f32 %v615_v30, %v614_v27  ;;  %v671_v32 = vpop.f32.mrb[9].mxu1  ;;  %v569_v27 = vld [vmem:[%s1017_s2] ss:$0 sm:$0xff]  ;;  %s935_s2 = smov [#allocation7]  }
 0x131   :  { %v672_v33 = vadd.f32 %v671_v32, %v670_v29  ;;  %s556_s13 = sshll.u32 %s935_s2, 4  ;;  %s557_s13 = int_to_ptr.vmem [resolvable:$true] %s556_s13 }
 0x132   :  { %v617_v34 = vpop.f32.mrb[10].mxu0  ;;  %s901_s14 = scalar_lea.vmem %s557_s13, 512  ;;  %p906_p3 = scmp.lt.s32.totalorder %s557_s13, %s557_s13 }
 0x133   :  { %v379_v35 = vadd.f32 %v672_v33, %v616_v31  ;;  %v673_v36 = vpop.f32.mrb[10].mxu1  ;;  %v618_v37 = vpop.f32.mrb[11].mxu0  ;;  %p902_p2 = scmp.ne.s32.totalorder %s557_s13, %s901_s14  ;;  %p907_p4 = scmp.lt.s32.totalorder %s901_s14, %s901_s14 }
 0x134   :  { %v619_v38 = vadd.f32 %v618_v37, %v617_v34  ;;  %v674_v39 = vpop.f32.mrb[11].mxu1 }
 0x135   :  { %v675_v40 = vadd.f32 %v674_v39, %v673_v36  ;;  %p908_p5 = por %p907_p4, %p906_p3 }
 0x136   :  { %v620_v41 = vpop.f32.mrb[12].mxu0 }
 0x137   :  { %v384_v42 = vadd.f32 %v675_v40, %v619_v38  ;;  %v676_v43 = vpop.f32.mrb[12].mxu1  ;;  %v621_v44 = vpop.f32.mrb[13].mxu0  ;;  %p909_p6 = pnand %p908_p5, %p902_p2 }
 0x138   :  { %v622_v45 = vadd.f32 %v621_v44, %v620_v41  ;;  %v677_v46 = vpop.f32.mrb[13].mxu1 }
 0x139   :  { %v678_v47 = vadd.f32 %v677_v46, %v676_v43 }
 0x13a   :  { %v623_v48 = vpop.f32.mrb[14].mxu0 }
 0x13b   :  { %v389_v49 = vadd.f32 %v678_v47, %v622_v45  ;;  %v679_v50 = vpop.f32.mrb[14].mxu1  ;;  %v624_v51 = vpop.f32.mrb[15].mxu0 }
 0x13c   :  { %v625_v52 = vadd.f32 %v624_v51, %v623_v48  ;;  %v680_v53 = vpop.f32.mrb[15].mxu1 }
 0x13d   :  { %v681_v54 = vadd.f32 %v680_v53, %v679_v50 }
 0x13e   :  { %v714_v55 = vpop.f32.mrb[16].mxu0 }
 0x13f   :  { %v394_v56 = vadd.f32 %v681_v54, %v625_v52  ;;  %v726_v57 = vpop.f32.mrb[16].mxu1  ;;  %v715_v58 = vpop.f32.mrb[17].mxu0 }
 0x140   :  { %v716_v59 = vadd.f32 %v715_v58, %v714_v55  ;;  %v727_v60 = vpop.f32.mrb[17].mxu1 }
 0x141   :  { %v728_v61 = vadd.f32 %v727_v60, %v726_v57 }
 0x142   :  { %v464_v62 = vadd.f32 %v716_v59, %v359_v7  ;;  %v717_v63 = vpop.f32.mrb[18].mxu0 }
 0x143   :  { %v484_v0 = vadd.f32 %v728_v61, %v379_v35  ;;  %v729_v1 = vpop.f32.mrb[18].mxu1  ;;  %v718_v2 = vpop.f32.mrb[19].mxu0 }
 0x144   :  { %v719_v3 = vadd.f32 %v718_v2, %v717_v63  ;;  %v730_v4 = vpop.f32.mrb[19].mxu1  ;;  %v511_v12 = vrot.slane %v464_v62, 1 }
 0x145   :  { %v731_v5 = vadd.f32 %v730_v4, %v729_v1  ;;  %v517_v17 = vrot.slane %v484_v0, 1 }
 0x146   :  { %v469_v6 = vadd.f32 %v719_v3, %v364_v14  ;;  %v720_v8 = vpop.f32.mrb[20].mxu0 }
 0x147   :  { %v489_v9 = vadd.f32 %v731_v5, %v384_v42  ;;  %v732_v10 = vpop.f32.mrb[20].mxu1  ;;  %v721_v11 = vpop.f32.mrb[21].mxu0 }
 0x148   :  { %v512_v13 = vrot.slane %v469_v6, 1  ;;  %v722_v15 = vadd.f32 %v721_v11, %v720_v8  ;;  %v733_v16 = vpop.f32.mrb[21].mxu1 }
 0x149   :  { %v518_v18 = vrot.slane %v489_v9, 1  ;;  %v734_v7 = vadd.f32 %v733_v16, %v732_v10 }
 0x14a   :  { %v513_v19 = vsel %vm510_vm0, %v511_v12, %v512_v13  ;;  %v474_v20 = vadd.f32 %v722_v15, %v983_v21  ;;  %v723_v22 = vpop.f32.mrb[22].mxu0 }
 0x14b   :  { %v527_v23 = vadd.f32 %v513_v19, %v464_v62  ;;  %v519_v14 = vsel %vm510_vm0, %v517_v17, %v518_v18  ;;  %v494_v24 = vadd.f32 %v734_v7, %v389_v49  ;;  %v735_v25 = vpop.f32.mrb[22].mxu1  ;;  %v724_v26 = vpop.f32.mrb[23].mxu0 }
 0x14c   :  { %v529_v29 = vadd.f32 %v519_v14, %v484_v0  ;;  %v725_v30 = vadd.f32 %v724_v26, %v723_v22  ;;  %v736_v31 = vpop.f32.mrb[23].mxu1  ;;  %v514_v38 = vrot.slane %v474_v20, 1 }
 0x14d   :  { %v531_v32 = vmul.f32 0.5, %v527_v23  ;;  %v737_v33 = vadd.f32 %v736_v31, %v735_v25  ;;  %v520_v40 = vrot.slane %v494_v24, 1 }
 0x14e   :  { %v533_v34 = vmul.f32 0.5, %v529_v29  ;;  %v479_v35 = vadd.f32 %v725_v30, %v985_v28 }
 0x14f   :  { %v542_v21 = vadd.f32 %v569_v27, %v531_v32  ;;  %v499_v36 = vadd.f32 %v737_v33, %v394_v56 }
 0x150   :  { %v544_v37 = vadd.f32 %v569_v27, %v533_v34  ;;  %v515_v39 = vrot.slane %v479_v35, 1 }
 0x151   :  { %v521_v41 = vrot.slane %v499_v36, 1  ;;  %547 = vst.msk [vmem:[#allocation7] sm:$0xff] %vm546_vm1, %v542_v21 }
 0x152   :  { %v516_v42 = vsel %vm510_vm0, %v514_v38, %v515_v39  ;;  %549 = vst.msk [vmem:[#allocation7 + $0x10] sm:$0xff] %vm546_vm1, %v544_v37 }
 0x153   :  { %v528_v43 = vadd.f32 %v516_v42, %v474_v20  ;;  %v522_v44 = vsel %vm510_vm0, %v520_v40, %v521_v41 }
 0x154   :  { %v530_v45 = vadd.f32 %v522_v44, %v494_v24 }
 0x155   :  { %v532_v46 = vmul.f32 0.5, %v528_v43 }
 0x156   :  { %v534_v28 = vmul.f32 0.5, %v530_v45 }
 0x157   :  { %v543_v47 = vadd.f32 %v569_v27, %v532_v46 }
 0x158   :  { %v545_v48 = vadd.f32 %v569_v27, %v534_v28 }
 0x159   :  { %548 = vst.msk [vmem:[#allocation7 + $0x8] sm:$0xff] %vm546_vm1, %v543_v47 }
 0x15a   :  { %550 = vst.msk [vmem:[#allocation7 + $0x18] sm:$0xff] %vm546_vm1, %v545_v48 }
 0x15b   :  { %912 = shalt.err (!%p909_p6)
}
 0x15c   :  { %s913_s17 = scalar_lea.hbm %s1018_s3, 512 }
 0x15d   :  { %p914_p7 = scmp.ne.s32.totalorder %s1018_s3, %s913_s17  ;;  %p917_p8 = scmp.lt.u32.totalorder %s913_s17, %s1018_s3 }
 0x15f   :  { %p919_p9 = pnand %p917_p8, %p914_p7 }
 0x161   :  { %922 = shalt.err (!%p919_p9)
}
 0x162   :  { %562 = dma.vmem_to_hbm [thread:$0]  %s557_s13, 512, %s1018_s3, [#allocation4], %s933_s0, %s933_s0, %s934_s9  }
 0x163   :  { %927 = dma.done.wait [#allocation4], 512  }
 0x164   :  { %928 = vsyncadd [#allocation4], 4294966784 }
 0x165   :  { %566 = vsyncpa [#allocation3], 1 }
 0x166   :  { %567 = vsyncpa [#allocation6], 1 }
 0x167   :  { %568 = vsyncpa [#allocation4], 1 }

</bundles_post_ra>
